<compile_context>
chip_gen: v6e
topology: v6e:2x2x1
jax: 0.10.0
libtpu: 0.0.40
codegen_flags: <defaults>
</compile_context>

<pallas_src>
import functools

import jax
import jax.numpy as jnp
from jax import lax
from jax.experimental import pallas as pl
from jax.experimental.pallas import tpu as pltpu


# ----------------------------------------------------------------------------
# Shared per-pixel NLL computation for one (image, pixel-tile) block.
#   logits_ref : (1, C, TW)  float  (classes on sublane, pixels on lane)
#   targets_ref: (1, 1, TW)  int32
#   cw_ref     : (C, 1)      float32 (class weights, resident)
# Returns (nll, valid): (1, TW) f32 weighted NLL and (1, TW) bool validity.
# ----------------------------------------------------------------------------
def _per_pixel_nll(logits_ref, targets_ref, cw_ref, *, ignore_index,
                   use_class_weight):
    x = logits_ref[0].astype(jnp.float32)            # (C, TW)
    tgt = targets_ref[0]                             # (1, TW) int32
    C = x.shape[0]

    # Numerically stable logsumexp over the class (sublane) axis.
    m = jnp.max(x, axis=0, keepdims=True)            # (1, TW)
    xm = x - m                                       # (C, TW)  (reused below)
    sumexp = jnp.sum(jnp.exp(xm), axis=0, keepdims=True)    # (1, TW)

    # One-hot pick of the target logit reusing (x - m); (C,1) iota vs (1,TW)
    # targets broadcasts to the compare without materializing a (C,TW) iota.
    cls = lax.broadcasted_iota(jnp.int32, (C, 1), 0)         # (C, 1)
    eq = cls == tgt                                          # (C, TW) bool
    picked = jnp.sum(jnp.where(eq, xm, 0.0), axis=0, keepdims=True)  # x_t - m
    nll = jnp.log(sumexp) - picked                           # lse - x_t

    if use_class_weight:
        w_t = jnp.sum(jnp.where(eq, cw_ref[...], 0.0), axis=0, keepdims=True)
        nll = nll * w_t

    valid = tgt != ignore_index                              # (1, TW) bool
    return nll, valid


def _ce_kernel_map(logits_ref, targets_ref, cw_ref, loss_ref, *,
                   ignore_index, use_class_weight):
    """Writes the per-pixel loss map block (1, 1, TW)."""
    nll, valid = _per_pixel_nll(logits_ref, targets_ref, cw_ref,
                                ignore_index=ignore_index,
                                use_class_weight=use_class_weight)
    # where (not multiply) so stale/NaN lanes of a partial last tile stay finite;
    # out-of-range lanes are discarded at writeback anyway.
    loss_ref[0] = jnp.where(valid, nll, 0.0)


def _ce_kernel_sum(logits_ref, targets_ref, cw_ref, psum_ref, *,
                   ignore_index, use_class_weight, tw, total_p):
    """Writes one (8,128) partial-sum block per grid step (fused mean/sum)."""
    nll, valid = _per_pixel_nll(logits_ref, targets_ref, cw_ref,
                                ignore_index=ignore_index,
                                use_class_weight=use_class_weight)
    # Mask out-of-range lanes of the partial last pixel tile so stale data
    # (possibly NaN/inf through exp) cannot contaminate the partial sum.
    pix = pl.program_id(1) * tw + lax.broadcasted_iota(jnp.int32, nll.shape, 1)
    loss = jnp.where(valid & (pix < total_p), nll, 0.0)      # (1, TW)
    s = jnp.sum(loss)                                        # scalar (XLU reduce)

    sub = lax.broadcasted_iota(jnp.int32, (8, 128), 0)
    lane = lax.broadcasted_iota(jnp.int32, (8, 128), 1)
    psum_ref[0, 0] = jnp.where((sub == 0) & (lane == 0), s, 0.0)


# ----------------------------------------------------------------------------
# Tiling / specs
# ----------------------------------------------------------------------------
def _choose_pixel_tile(N, P, C, itemsize):
    """Pixel-lane tile: capped at 8192 lanes and ~2 MiB per logits buffer
    (double-buffered ~4 MiB) -> fits v5e/v6e/v7x VMEM with big headroom while
    amortizing per-grid-step overhead.  Splits single-block grids so both v7x
    TensorCores get work."""
    # TODO(synk): vocab-scale C (>~24K classes f32) needs a class-axis grid with
    # an online max/logsumexp accumulator; guard instead of silently OOMing.
    if C * 128 * itemsize > 12 * 1024 * 1024:
        raise NotImplementedError("class dimension too large for a single-block "
                                  "class axis; needs online-LSE class tiling")
    budget = 2 * 1024 * 1024                      # per logits buffer
    tw = budget // max(1, C * itemsize)
    tw = min(tw, 8192)                            # lane cap (perf review)
    tw = max(128, (tw // 128) * 128)
    if tw >= P:
        tw = P                                    # full extent: always legal
        if N == 1 and P >= 256:                   # give both v7x TCs a block
            tw = max(128, ((P // 2) // 128) * 128)
    return tw


def _common_specs(N, C, P, tw):
    grid = (N, pl.cdiv(P, tw))                    # no wrapper-side padding
    in_specs = [
        pl.BlockSpec((1, C, tw), lambda n, p: (n, 0, p)),   # logits tile
        pl.BlockSpec((1, 1, tw), lambda n, p: (n, 0, p)),   # targets tile
        pl.BlockSpec((C, 1), lambda n, p: (0, 0)),          # class weights
    ]
    return grid, in_specs


_COMPILER_PARAMS = pltpu.CompilerParams(
    dimension_semantics=("parallel", "parallel"),
    vmem_limit_bytes=32 * 1024 * 1024,            # safe on v7x's 64 MiB too
)


def _pixelwise_ce(logits, targets, class_weight, ignore_index, use_class_weight):
    """logits (N, C, P), targets (N, P) -> per-pixel loss (N, P) float32."""
    N, C, P = logits.shape
    tw = _choose_pixel_tile(N, P, C, logits.dtype.itemsize)
    tgt3 = targets.astype(jnp.int32).reshape(N, 1, P)        # free reshape
    cw = class_weight.astype(jnp.float32).reshape(C, 1)

    kernel = functools.partial(_ce_kernel_map, ignore_index=ignore_index,
                               use_class_weight=use_class_weight)
    grid, in_specs = _common_specs(N, C, P, tw)
    loss = pl.pallas_call(
        kernel,
        out_shape=jax.ShapeDtypeStruct((N, 1, P), jnp.float32),
        grid_spec=pltpu.PrefetchScalarGridSpec(
            num_scalar_prefetch=0, grid=grid, in_specs=in_specs,
            out_specs=pl.BlockSpec((1, 1, tw), lambda n, p: (n, 0, p))),
        compiler_params=_COMPILER_PARAMS,
    )(logits, tgt3, cw)
    return loss.reshape(N, P)


def _fused_ce_sum(logits, targets, class_weight, ignore_index, use_class_weight):
    """Fused sum over all pixels: avoids the (N, P) loss-map HBM round trip."""
    N, C, P = logits.shape
    tw = _choose_pixel_tile(N, P, C, logits.dtype.itemsize)
    pt = pl.cdiv(P, tw)
    tgt3 = targets.astype(jnp.int32).reshape(N, 1, P)
    cw = class_weight.astype(jnp.float32).reshape(C, 1)

    kernel = functools.partial(_ce_kernel_sum, ignore_index=ignore_index,
                               use_class_weight=use_class_weight,
                               tw=tw, total_p=P)
    grid, in_specs = _common_specs(N, C, P, tw)
    partials = pl.pallas_call(
        kernel,
        out_shape=jax.ShapeDtypeStruct((N, pt, 8, 128), jnp.float32),
        grid_spec=pltpu.PrefetchScalarGridSpec(
            num_scalar_prefetch=0, grid=grid, in_specs=in_specs,
            out_specs=pl.BlockSpec((1, 1, 8, 128), lambda n, p: (n, p, 0, 0))),
        compiler_params=_COMPILER_PARAMS,
    )(logits, tgt3, cw)
    return jnp.sum(partials)                      # tiny host-side finish


def weight_reduce_loss(loss, weight=None, reduction="mean"):
    if weight is not None:
        loss = loss * weight.astype(jnp.float32)
    if reduction == "mean":
        return jnp.mean(loss)
    if reduction == "sum":
        return jnp.sum(loss)
    return loss  # 'none'


class CrossEntropyLoss:
    """JAX/Pallas port of the PyTorch CrossEntropyLoss module (spec semantics)."""

    def __init__(self, class_weights=None, reduction="mean", loss_weight=1.0):
        self.class_weight = class_weights
        self.reduction = reduction
        self.loss_weight = loss_weight

    def __call__(self, inputs, targets, weight=None, ignore_index=-100):
        # inputs: (N, C) or (N, C, *spatial); targets: (N,) or (N, *spatial)
        if inputs.ndim == 2:
            N, C = inputs.shape
            # TODO(synk): a classes-on-lane kernel variant would avoid this HBM
            # transpose for large 2D (tokens x vocab) inputs.
            logits3 = inputs.T.reshape(1, C, N)
            tgt2 = targets.reshape(1, N)
            out_shape = targets.shape
        else:
            N, C = inputs.shape[0], inputs.shape[1]
            spatial = inputs.shape[2:]
            logits3 = inputs.reshape(N, C, -1)     # free reshape, NO transpose
            tgt2 = targets.reshape(N, -1)
            out_shape = (N,) + tuple(spatial)

        use_cw = self.class_weight is not None
        cw = (jnp.asarray(self.class_weight, jnp.float32) if use_cw
              else jnp.ones((C,), jnp.float32))
        # TODO(synk): out-of-range targets (other than ignore_index) produce 0
        # loss instead of raising like PyTorch (cannot raise from a kernel).

        if self.reduction in ("mean", "sum") and weight is None:
            # Fused-reduction path: partial sums only, no (N, P) loss map.
            total = _fused_ce_sum(logits3, tgt2, cw, ignore_index, use_cw)
            loss = total / tgt2.size if self.reduction == "mean" else total
        else:
            loss = _pixelwise_ce(logits3, tgt2, cw, ignore_index, use_cw)
            loss = loss.reshape(-1)
            w = None if weight is None else weight.reshape(-1).astype(jnp.float32)
            loss = weight_reduce_loss(loss, weight=w, reduction=self.reduction)
            if self.reduction == "none":
                loss = loss.reshape(out_shape)
        return self.loss_weight * loss


# ----------------------------------------------------------------------------
# Pure-JAX reference matching F.cross_entropy(reduction='none') + plain
# mean/sum (spec module semantics).
# ----------------------------------------------------------------------------
def _reference(inputs, targets, class_weight, weight=None, ignore_index=-100,
               reduction="mean", loss_weight=1.0):
    C = inputs.shape[1]
    logits_2d = jnp.moveaxis(inputs, 1, -1).reshape(-1, C).astype(jnp.float32)
    tgt = targets.reshape(-1)
    valid = tgt != ignore_index
    safe_tgt = jnp.where(valid, tgt, 0)
    logp = jax.nn.log_softmax(logits_2d, axis=-1)
    nll = -jnp.take_along_axis(logp, safe_tgt[:, None], axis=-1)[:, 0]
    w_t = class_weight[safe_tgt]
    loss = jnp.where(valid, nll * w_t, 0.0)
    if weight is not None:
        loss = loss * weight.reshape(-1).astype(jnp.float32)
    if reduction == "mean":
        loss = jnp.mean(loss)
    elif reduction == "sum":
        loss = jnp.sum(loss)
    else:
        loss = loss.reshape(targets.shape)
    return loss_weight * loss


if __name__ == "__main__":
    key = jax.random.PRNGKey(0)
    k1, k2, k3, k4, k5, k6, k7, k8 = jax.random.split(key, 8)

    # ---- 1) 4D segmentation case (NCHW), class weights + ignore_index, mean
    #         -> exercises the fused partial-sum path.
    N, C, H, W = 2, 10, 8, 8
    inputs = jax.random.normal(k1, (N, C, H, W), jnp.float32)
    targets = jax.random.randint(k2, (N, H, W), 0, C, jnp.int32)
    ignore_mask = jax.random.bernoulli(k3, 0.1, (N, H, W))
    targets = jnp.where(ignore_mask, -100, targets)
    class_weights = jnp.linspace(0.5, 1.5, C).astype(jnp.float32)

    loss_mod = CrossEntropyLoss(class_weights=class_weights,
                                reduction="mean", loss_weight=1.0)
    loss = jax.block_until_ready(
        loss_mod(inputs, targets, weight=None, ignore_index=-100))
    ref = _reference(inputs, targets, class_weights)
    assert jnp.allclose(loss, ref, atol=1e-5, rtol=1e-5), (loss, ref)

    # ---- 2) 2D classification case, reduction='none' (loss-map path)
    N2, C2 = 8, 10
    x2 = jax.random.normal(k4, (N2, C2), jnp.float32)
    t2 = jax.random.randint(k5, (N2,), 0, C2, jnp.int32)
    loss_mod2 = CrossEntropyLoss(class_weights=class_weights, reduction="none")
    l2 = jax.block_until_ready(loss_mod2(x2, t2))
    ref2 = _reference(x2, t2, class_weights, reduction="none")
    assert l2.shape == (N2,)
    assert jnp.allclose(l2, ref2, atol=1e-5, rtol=1e-5), (l2, ref2)

    # ---- 3) 4D case, no class weights, per-element weight, reduction='sum'
    #         -> loss-map path with use_class_weight=False.
    N3, C3, H3, W3 = 2, 4, 16, 16
    x3 = jax.random.normal(k6, (N3, C3, H3, W3), jnp.float32)
    t3 = jax.random.randint(k7, (N3, H3, W3), 0, C3, jnp.int32)
    w3 = jax.random.uniform(k8, (N3, H3, W3), jnp.float32)
    loss_mod3 = CrossEntropyLoss(class_weights=None, reduction="sum",
                                 loss_weight=2.0)
    l3 = jax.block_until_ready(loss_mod3(x3, t3, weight=w3))
    ref3 = _reference(x3, t3, jnp.ones((C3,), jnp.float32), weight=w3,
                      reduction="sum", loss_weight=2.0)
    assert jnp.allclose(l3, ref3, atol=1e-4, rtol=1e-5), (l3, ref3)

    print("KERNEL_OK")
</pallas_src>

<mosaic_0001>
module attributes {stable_mosaic.version = 11 : i64} {
  func.func @_ce_kernel_sum(%arg0: i32, %arg1: i32, %arg2: memref<1x10x64xf32, #tpu.memory_space<vmem>>, %arg3: memref<1x1x64xi32, #tpu.memory_space<vmem>>, %arg4: memref<10x1xf32, #tpu.memory_space<vmem>>, %arg5: memref<1x1x8x128xf32, #tpu.memory_space<vmem>>) attributes {dimension_semantics = [#tpu.dimension_semantics<parallel>, #tpu.dimension_semantics<parallel>], iteration_bounds = array<i64: 2, 1>, scalar_prefetch = 0 : i64, scratch_operands = 0 : i64, tpu.core_type = #tpu.core_type<tc>, window_params = [{transform_indices = @transform_0, window_bounds = array<i64: 1, 10, 64>}, {transform_indices = @transform_1, window_bounds = array<i64: 1, 1, 64>}, {pipeline_mode = #tpu.pipeline_mode<synchronous>, transform_indices = @transform_2, window_bounds = array<i64: 10, 1>}, {transform_indices = @transform_3, window_bounds = array<i64: 1, 1, 8, 128>}]} {
    %c0 = arith.constant 0 : index
    %c0_0 = arith.constant 0 : index
    %c0_1 = arith.constant 0 : index
    %0 = vector.load %arg2[%c0, %c0_0, %c0_1] : memref<1x10x64xf32, #tpu.memory_space<vmem>>, vector<1x10x64xf32>
    %1 = vector.shape_cast %0 : vector<1x10x64xf32> to vector<10x64xf32>
    %c0_2 = arith.constant 0 : index
    %c0_3 = arith.constant 0 : index
    %c0_4 = arith.constant 0 : index
    %2 = vector.load %arg3[%c0_2, %c0_3, %c0_4] : memref<1x1x64xi32, #tpu.memory_space<vmem>>, vector<1x1x64xi32>
    %3 = vector.shape_cast %2 : vector<1x1x64xi32> to vector<1x64xi32>
    %cst = arith.constant dense<0xFF800000> : vector<64xf32>
    %4 = vector.multi_reduction <maximumf>, %1, %cst [0] : vector<10x64xf32> to vector<64xf32>
    %5 = vector.shape_cast %4 : vector<64xf32> to vector<1x64xf32>
    %6 = vector.broadcast %5 : vector<1x64xf32> to vector<10x64xf32>
    %7 = arith.subf %1, %6 : vector<10x64xf32>
    %8 = math.exp %7 : vector<10x64xf32>
    %cst_5 = arith.constant dense<0.000000e+00> : vector<64xf32>
    %9 = vector.multi_reduction <add>, %8, %cst_5 [0] : vector<10x64xf32> to vector<64xf32>
    %10 = vector.shape_cast %9 : vector<64xf32> to vector<1x64xf32>
    %11 = tpu.iota {dimensions = array<i32: 0>} : vector<10x1xi32>
    %12 = vector.broadcast %11 : vector<10x1xi32> to vector<10x64xi32>
    %13 = vector.broadcast %3 : vector<1x64xi32> to vector<10x64xi32>
    %14 = arith.cmpi eq, %12, %13 : vector<10x64xi32>
    %cst_6 = arith.constant 0.000000e+00 : f32
    %15 = vector.broadcast %cst_6 : f32 to vector<10x64xf32>
    %16 = arith.select %14, %7, %15 : vector<10x64xi1>, vector<10x64xf32>
    %cst_7 = arith.constant dense<0.000000e+00> : vector<64xf32>
    %17 = vector.multi_reduction <add>, %16, %cst_7 [0] : vector<10x64xf32> to vector<64xf32>
    %18 = vector.shape_cast %17 : vector<64xf32> to vector<1x64xf32>
    %19 = math.log %10 : vector<1x64xf32>
    %20 = arith.subf %19, %18 : vector<1x64xf32>
    %c0_8 = arith.constant 0 : index
    %c0_9 = arith.constant 0 : index
    %21 = vector.load %arg4[%c0_8, %c0_9] : memref<10x1xf32, #tpu.memory_space<vmem>>, vector<10x1xf32>
    %cst_10 = arith.constant 0.000000e+00 : f32
    %22 = vector.shape_cast %21 : vector<10x1xf32> to vector<10x1xf32>
    %23 = vector.broadcast %22 : vector<10x1xf32> to vector<10x64xf32>
    %24 = vector.broadcast %cst_10 : f32 to vector<10x64xf32>
    %25 = arith.select %14, %23, %24 : vector<10x64xi1>, vector<10x64xf32>
    %cst_11 = arith.constant dense<0.000000e+00> : vector<64xf32>
    %26 = vector.multi_reduction <add>, %25, %cst_11 [0] : vector<10x64xf32> to vector<64xf32>
    %27 = vector.shape_cast %26 : vector<64xf32> to vector<1x64xf32>
    %28 = arith.mulf %20, %27 : vector<1x64xf32>
    %c-100_i32 = arith.constant -100 : i32
    %29 = vector.broadcast %c-100_i32 : i32 to vector<1x64xi32>
    %30 = arith.cmpi ne, %3, %29 : vector<1x64xi32>
    %c64_i32 = arith.constant 64 : i32
    %31 = arith.muli %arg1, %c64_i32 : i32
    %32 = tpu.iota {dimensions = array<i32: 1>} : vector<1x64xi32>
    %33 = vector.broadcast %31 : i32 to vector<1x64xi32>
    %34 = arith.addi %33, %32 : vector<1x64xi32>
    %c64_i32_12 = arith.constant 64 : i32
    %35 = vector.broadcast %c64_i32_12 : i32 to vector<1x64xi32>
    %36 = arith.cmpi slt, %34, %35 : vector<1x64xi32>
    %37 = arith.andi %30, %36 : vector<1x64xi1>
    %cst_13 = arith.constant 0.000000e+00 : f32
    %38 = vector.broadcast %cst_13 : f32 to vector<1x64xf32>
    %39 = arith.select %37, %28, %38 : vector<1x64xi1>, vector<1x64xf32>
    %40 = vector.shape_cast %39 : vector<1x64xf32> to vector<1x1x64xf32>
    %cst_14 = arith.constant dense<0.000000e+00> : vector<1xf32>
    %41 = vector.multi_reduction <add>, %40, %cst_14 [1, 2] : vector<1x1x64xf32> to vector<1xf32>
    %42 = vector.shape_cast %41 : vector<1xf32> to vector<1x1x1xf32>
    %43 = vector.extract %42[0, 0, 0] : f32 from vector<1x1x1xf32>
    %44 = tpu.iota {dimensions = array<i32: 0>} : vector<8x128xi32>
    %45 = tpu.iota {dimensions = array<i32: 1>} : vector<8x128xi32>
    %c0_i32 = arith.constant 0 : i32
    %46 = vector.broadcast %c0_i32 : i32 to vector<8x128xi32>
    %47 = arith.cmpi eq, %44, %46 : vector<8x128xi32>
    %c0_i32_15 = arith.constant 0 : i32
    %48 = vector.broadcast %c0_i32_15 : i32 to vector<8x128xi32>
    %49 = arith.cmpi eq, %45, %48 : vector<8x128xi32>
    %50 = arith.andi %47, %49 : vector<8x128xi1>
    %cst_16 = arith.constant 0.000000e+00 : f32
    %51 = vector.broadcast %43 : f32 to vector<8x128xf32>
    %52 = vector.broadcast %cst_16 : f32 to vector<8x128xf32>
    %53 = arith.select %50, %51, %52 : vector<8x128xi1>, vector<8x128xf32>
    %c0_17 = arith.constant 0 : index
    %c0_18 = arith.constant 0 : index
    %c0_19 = arith.constant 0 : index
    %c0_20 = arith.constant 0 : index
    %54 = vector.load %arg5[%c0_17, %c0_18, %c0_19, %c0_20] : memref<1x1x8x128xf32, #tpu.memory_space<vmem>>, vector<1x1x8x128xf32>
    %55 = vector.shape_cast %54 : vector<1x1x8x128xf32> to vector<8x128xf32>
    %56 = vector.shape_cast %53 : vector<8x128xf32> to vector<1x1x8x128xf32>
    tpu.vector_store %arg5[%c0_17, %c0_18, %c0_19, %c0_20], %56 {strides = array<i32>} : memref<1x1x8x128xf32, #tpu.memory_space<vmem>>, vector<1x1x8x128xf32>,
    return
  }
  func.func @transform_0(%arg0: i32, %arg1: i32) -> (i32, i32, i32) {
    %c0_i32 = arith.constant 0 : i32
    %c0_i32_0 = arith.constant 0 : i32
    return %arg0, %c0_i32, %arg1 : i32, i32, i32
  }
  func.func @transform_1(%arg0: i32, %arg1: i32) -> (i32, i32, i32) {
    %c0_i32 = arith.constant 0 : i32
    %c0_i32_0 = arith.constant 0 : i32
    return %arg0, %c0_i32, %arg1 : i32, i32, i32
  }
  func.func @transform_2(%arg0: i32, %arg1: i32) -> (i32, i32) {
    %c0_i32 = arith.constant 0 : i32
    %c0_i32_0 = arith.constant 0 : i32
    %c0_i32_1 = arith.constant 0 : i32
    return %c0_i32, %c0_i32_0 : i32, i32
  }
  func.func @transform_3(%arg0: i32, %arg1: i32) -> (i32, i32, i32, i32) {
    %c0_i32 = arith.constant 0 : i32
    %c0_i32_0 = arith.constant 0 : i32
    %c0_i32_1 = arith.constant 0 : i32
    return %arg0, %arg1, %c0_i32, %c0_i32_0 : i32, i32, i32, i32
  }
}

</mosaic_0001>

<bundles_post_ra>
// kernel: tpu_custom_call.1
= control target key start
LH: loop header
LB: loop body
LE: loop exit
PB: predicated region body
PF: predicated region fallthrough
CT: control target
= control target key end

     0   :  { %8 = vsyncpa [#allocation3], 0  ;;  %s734_s0 = inlined_call_operand.vmem [shape: f32[2,10,64], index: 0, kind: input, shape index: {}]   ;;  %s735_s1 = inlined_call_operand.vmem [shape: s32[2,1,64], index: 1, kind: input, shape index: {}]   ;;  %s736_s2 = inlined_call_operand.vmem [shape: f32[10,1], index: 2, kind: input, shape index: {}]   ;;  %s737_s3 = inlined_call_operand.hbm [shape: f32[2,1,8,128], index: 3, kind: output, shape index: {}]  }
   0x1   :  { %10 = vsyncpa [#allocation3 + $0x1], 0  ;;  %s600_s12 = smov 0   ;;  %s602_s13 = smov 0  }
   0x2   :  { %s604_s14 = smov 0   ;;  %s606_s15 = smov 0  }
   0x3   :  { %s608_s16 = smov 0   ;;  %s610_s17 = smov 0  }
   0x4 LB: > { %s422_s18 = sadd.s32 4294967295, %s576_s17   ;;  %s423_s19 = sadd.s32 4294967294, %s576_s17   ;;  %s576_s17 = sphi %s610_s17, %s16_s17   ;;  %s572_s16 = sphi %s608_s16, %s744_s16   ;;  %s568_s15 = sphi %s606_s15, %s743_s15   ;;  %s564_s14 = sphi %s604_s14, %s742_s14   ;;  %s560_s13 = sphi %s602_s13, %s741_s13   ;;  %s556_s12 = sphi %s600_s12, %s740_s12  }
   0x5   : > { %s28_s20 = sadd.s32 1, %s572_s16  ;;  %s114_s21 = sadd.s32 1, %s564_s14 }
   0x6   : > { %p30_p0 = scmp.ge.s32.totalorder %s28_s20, 2  ;;  %p124_p1 = scmp.ne.s32.totalorder %s564_s14, %s560_s13 }
   0x7   : > { %p125_p2 = scmp.eq.s32.totalorder %s422_s18, 1  ;;  %p130_p3 = scmp.ne.s32.totalorder %s560_s13, %s556_s12 }
   0x8   : > { %s746_s20 = smov (%p30_p0, %s28_s20), 0  ;;  %p131_p5 = scmp.eq.s32.totalorder %s423_s19, 1 }
   0x9   : > { %p640_p4 = por %p125_p2, %p124_p1  ;;  %s109_s23 = ssub.s32 %s572_s16, %s746_s20 }
   0xa   : > { %p426_p6 = scmp.ge.s32.totalorder %s576_s17, 1  ;;  %p112_p7 = scmp.eq.s32.totalorder %s109_s23, 0 }
   0xb   : > { %p647_p8 = por %p131_p5, %p130_p3  ;;  %p172_p9 = scmp.lt.s32.totalorder %s576_s17, 3 }
   0xc   : > { %s653_s25 = scalar_select %p112_p7, %s564_s14, %s114_s21  }
   0xd   : > { %p173_p10 = pnand %p426_p6, %p172_p9 }
   0xe   : > { %p205_p11 = scmp.lt.s32.totalorder (!%p173_p10), %s568_s15, 1  ;;  %s202_s11 = sand.u32 (!%p173_p10), 1, %s560_s13  }
   0xf   : > { %176 = sbr.rel (%p173_p10) target bundleno = 385 (0x181), region = 32  ;;  %s427_s18 = sshll.u32 (!%p173_p10), %s202_s11, 3 }
  0x10   : > { %s431_s19 = sshll.u32 (!%p173_p10), %s568_s15, 7  ;;  %s204_s21 = scalar_lea.vmem (!%p173_p10), [#allocation2], %s427_s18 }
  0x11   : > { %s336_s23 = sshll.u32 (!%p173_p10), %s204_s21, 4  ;;  %s694_s29 = scalar_lea.hbm (!%p173_p10), %s737_s3, %s431_s19  ;;  %s337_s23 = int_to_ptr.vmem [resolvable:$true] %s336_s23 }
  0x14   : > { %v271_v0 = vld [vmem:[%s736_s2] sm:$0xff]  ;;  %v578_v1 = vmov 0   ;;  %v272_v2 = vld [vmem:[%s736_s2 + $0x8] sm:$0x3]  ;;  %s663_s30 = scalar_select %p205_p11, %s568_s15, 1  ;;  %vm222_vm0 = vcmask 523264   ;;  %v248_v21 = vlaneseq }
  0x15   : > { %493 = vset.pattern.permute.xlu0 %v578_v1  ;;  %vm224_vm1 = vcmask 517120   ;;  %vm304_vm7 = vcmask 516096   ;;  %s579_s15 = smov [#allocation2]  }
  0x16   : > { %275 = vperm.xlu0 %493, %v271_v0   ;;  %s434_s4 = sshll.u32 %s663_s30, 4  ;;  %v673_v24 = vshrl.u32 %v248_v21, 7  ;;  %s218_s10 = scalar_lea.vmem %s735_s1, %s663_s30  ;;  %v298_v58 = vand.u32 127, %v248_v21 }
  0x17   : > { %s212_s7 = scalar_lea.vmem %s734_s0, %s434_s4  ;;  %v221_v27 = vld [vmem:[%s218_s10] sm:$0x1]  ;;  %s322_s30 = scalar_lea.sflag [#allocation3], %s202_s11 }
  0x18   : > { %v219_v3 = vld [vmem:[%s212_s7] sm:$0xff]  ;;  %v220_v4 = vld [vmem:[%s212_s7 + $0x8] sm:$0x3]  ;;  %v253_v26 = vsub.s32 0, %v673_v24  ;;  %v250_v28 = vadd.s32 8, %v673_v24  ;;  %vm295_vm4 = vcmp.ne.s32.totalorder %v221_v27, 4294967196 }
  0x19   : > { %v223_v5 = vsel %vm222_vm0, %v219_v3, -inf  ;;  %v225_v6 = vsel %vm224_vm1, %v220_v4, -inf  ;;  %vm301_vm5 = vcmp.lt.s32.totalorder %v298_v58, 64  ;;  %vm315_vm8 = vcmp.eq.s32.totalorder %v673_v24, 0  ;;  %s500_s4 = scalar_lea.vmem %s337_s23, 128  ;;  %s504_s5 = sshll.u32 %s579_s15, 4  ;;  %s505_s5 = int_to_ptr.vmem [resolvable:$false] %s504_s5 }
  0x1a   : > { %280 = vperm.xlu0 %493, %v272_v2   ;;  %v226_v7 = vmax.f32 %v223_v5, %v225_v6  ;;  %v254_v30 = vrot.slane %v221_v27, %v253_v26  ;;  %vm302_vm6 = vmand %vm295_vm4, %vm301_vm5  ;;  %vm316_vm9 = vcmp.eq.s32.totalorder %v298_v58, 0  ;;  %p501_p12 = scmp.ne.s32.totalorder %s337_s23, %s500_s4  ;;  %s506_s6 = scalar_lea.vmem %s505_s5, 256 }
  0x1b   : > { %vm317_vm10 = vmand %vm315_vm8, %vm316_vm9  ;;  %p507_p1 = scmp.lt.s32.totalorder %s337_s23, %s505_s5  ;;  %p508_p2 = scmp.lt.s32.totalorder %s506_s6, %s500_s4 }
  0x1c   : > { %v227_v8 = vrot.slane %v226_v7, 4  ;;  %vm256_vm2 = vcmp.eq.s32.totalorder %v250_v28, %v254_v30  ;;  %vm255_vm3 = vcmp.eq.s32.totalorder %v673_v24, %v254_v30  ;;  %p502_p13 = pnand %p501_p12, %p640_p4 }
  0x1d   : > { %p509_p3 = por %p508_p2, %p507_p1 }
  0x1e   : > { %v228_v9 = vmax.f32 %v226_v7, %v227_v8  ;;  %p503_p0 = pneg %p502_p13 }
  0x20   : > { %v229_v10 = vrot.slane %v228_v9, 2  ;;  %p510_p5 = pnand %p509_p3, %p503_p0 }
  0x22   : > { %v230_v11 = vmax.f32 %v228_v9, %v229_v10 }
  0x24   : > { %v231_v12 = vrot.slane %v230_v11, 1 }
  0x26   : > { %v232_v13 = vmax.f32 %v230_v11, %v231_v12 }
  0x28   : > { %v233_v14 = vsub.f32 %v219_v3, %v232_v13  ;;  %v234_v15 = vsub.f32 %v220_v4, %v232_v13 }
  0x2a   : > { %v235_v16 = vmul.f32 1.442695, %v233_v14  ;;  %v237_v17 = vmul.f32 1.442695, %v234_v15  ;;  %v257_v32 = vsel %vm255_vm3, %v233_v14, 0.0  ;;  %v258_v33 = vsel %vm256_vm2, %v234_v15, 0.0 }
  0x2b   : > { %v259_v35 = vsel %vm222_vm0, %v257_v32, 0.0  ;;  %v260_v36 = vsel %vm224_vm1, %v258_v33, 0.0 }
  0x2c   : > { %494 = vpow2.f32 %v235_v16  ;;  %v261_v37 = vadd.f32 %v260_v36, %v259_v35 }
  0x2d   : > { %496 = vpow2.f32 %v237_v17 }
  0x2e   : > { %v262_v39 = vrot.slane %v261_v37, 4 }
  0x30   : > { %v263_v41 = vadd.f32 %v262_v39, %v261_v37 }
  0x32   : > { %v264_v43 = vrot.slane %v263_v41, 2 }
  0x34   : > { %v265_v46 = vadd.f32 %v264_v43, %v263_v41 }
  0x36   : > { %v266_v52 = vrot.slane %v265_v46, 1 }
  0x38   : > { %v267_v56 = vadd.f32 %v266_v52, %v265_v46 }
  0x39   : > { %v495_v18 = vpop.eup %494 }
  0x3a   : > { %v497_v19 = vpop.eup %496  ;;  %v239_v20 = vsel %vm222_vm0, %v495_v18, 0.0 }
  0x3b   : > { %v240_v22 = vsel %vm224_vm1, %v497_v19, 0.0 }
  0x3c   : > { %v241_v23 = vadd.f32 %v240_v22, %v239_v20 }
  0x3e   : > { %v242_v25 = vrot.slane %v241_v23, 4 }
  0x40   : > { %v243_v29 = vadd.f32 %v242_v25, %v241_v23 }
  0x42   : > { %v244_v31 = vrot.slane %v243_v29, 2 }
  0x44   : > { %v245_v34 = vadd.f32 %v244_v31, %v243_v29 }
  0x46   : > { %v246_v38 = vrot.slane %v245_v34, 1 }
  0x48   : > { %v247_v40 = vadd.f32 %v246_v38, %v245_v34 }
  0x4a   : > { %498 = vlog2.f32 %v247_v40 }
  0x57   : > { %v499_v53 = vpop.eup %498 }
  0x58   : > { %v269_v57 = vmul.f32 0.6931472, %v499_v53 }
  0x5a   : > { %v270_v60 = vsub.f32 %v269_v57, %v267_v56 }
  0x91   : > { %v276_v42 = vpop.permute.xlu0 %275 }
  0x92   : > { %v283_v44 = vsel %vm255_vm3, %v276_v42, 0.0 }
  0x93   : > { %v285_v48 = vsel %vm222_vm0, %v283_v44, 0.0 }
  0x95   : > { %v281_v45 = vpop.permute.xlu0 %280 }
  0x96   : > { %v284_v47 = vsel %vm256_vm2, %v281_v45, 0.0 }
  0x97   : > { %v286_v49 = vsel %vm224_vm1, %v284_v47, 0.0 }
  0x98   : > { %v287_v50 = vadd.f32 %v286_v49, %v285_v48 }
  0x9a   : > { %v288_v51 = vrot.slane %v287_v50, 4 }
  0x9c   : > { %v289_v54 = vadd.f32 %v288_v51, %v287_v50 }
  0x9e   : > { %v290_v55 = vrot.slane %v289_v54, 2 }
  0xa0   : > { %v291_v59 = vadd.f32 %v290_v55, %v289_v54 }
  0xa2   : > { %v292_v61 = vrot.slane %v291_v59, 1 }
  0xa4   : > { %v293_v62 = vadd.f32 %v292_v61, %v291_v59 }
  0xa6   : > { %v294_v63 = vmul.f32 %v293_v62, %v270_v60 }
  0xa8   : > { %v303_v0 = vsel %vm302_vm6, %v294_v63, 0.0 }
  0xa9   : > { %v305_v1 = vsel %vm304_vm7, %v303_v0, 0.0 }
  0xaa   : > { %306 = vadd.xlane.f32.xlu1 %v305_v1 }
 0x133   : > { %v307_v2 = vpop.xlane.xlu1 %306 }
 0x134   : > { %v308_v3 = vrot.slane %v307_v2, 4 }
 0x136   : > { %v309_v4 = vadd.f32 %v308_v3, %v307_v2 }
 0x138   : > { %v310_v5 = vrot.slane %v309_v4, 2 }
 0x13a   : > { %v311_v6 = vadd.f32 %v310_v5, %v309_v4 }
 0x13c   : > { %v312_v7 = vrot.slane %v311_v6, 1 }
 0x13e   : > { %v313_v8 = vadd.f32 %v312_v7, %v311_v6 }
 0x140   : > { %435 = vpush %v313_v8 }
 0x171   : > { %s436_s26 = spop %435 }
 0x172   : > { %v318_v9 = vstv %s436_s26 }
 0x173   : > { %v319_v10 = vsel %vm317_vm10, %v318_v9, 0.0 }
 0x174   : > { %320 = vst [vmem:[%s204_s21] sm:$0xff] %v319_v10 }
 0x175   : > { %513 = shalt.err (!%p510_p5)
}
 0x176   : > { %s514_s7 = scalar_lea.hbm %s694_s29, 128  ;;  %s518_s10 = scalar_lea.hbm %s737_s3, 256 }
 0x177   : > { %p515_p6 = scmp.ne.s32.totalorder %s694_s29, %s514_s7  ;;  %p519_p10 = scmp.lt.s32.totalorder %s694_s29, %s737_s3 }
 0x178   : > { %p520_p11 = scmp.lt.s32.totalorder %s518_s10, %s514_s7 }
 0x179   : > { %p516_p7 = pnand %p515_p6, %p640_p4 }
 0x17a   : > { %p521_p12 = por %p520_p11, %p519_p10 }
 0x17b   : > { %p517_p9 = pneg %p516_p7 }
 0x17d   : > { %p522_p13 = pnand %p521_p12, %p517_p9 }
 0x17f   : > { %525 = shalt.err (!%p522_p13)
}
 0x180   : > { %437 = dma.vmem_to_hbm [thread:$0]  (%p640_p4), %s337_s23, 128, %s694_s29, %s322_s30  }
 0x181 PF: > { %p443_p0 = scmp.ge.s32.totalorder %s576_s17, 2  ;;  %s348_s19 = sand.u32 1, %s556_s12  }
 0x182   : > { %s349_s21 = scalar_lea.sflag [#allocation3], %s348_s19 }
 0x183   : > { %p440_p1 = pnand %p443_p0, %p647_p8 }
 0x185   : > { %p441_p2 = pneg %p440_p1 }
 0x187   : > { %551 = dma.done.wait (%p441_p2), %s349_s21, 128  }
 0x188   : > { %553 = vsyncadd (%p441_p2), %s349_s21, 4294967168  ;;  %s16_s17 = sadd.s32 1, %s576_s17   ;;  %s740_s12 = smov %s560_s13 }
 0x189   : > { %p13_p3 = scmp.ge.s32.totalorder %s16_s17, 4   ;;  %s741_s13 = smov %s564_s14 }
 0x18a   : > { %s742_s14 = smov %s653_s25  ;;  %s743_s15 = smov %s572_s16 }
 0x18b   : > { %s744_s16 = smov %s746_s20  ;;  %15 = sbr.rel (!%p13_p3) target bundleno = 4 (0x4), region = 70 }
 0x190   :  { %354 = vsyncpa [#allocation3], 1 }
 0x191   :  { %356 = vsyncpa [#allocation3 + $0x1], 1 }

</bundles_post_ra>
